<compile_context>
chip_gen: v7x
topology: tpu7x:2x2x1
jax: 0.10.0
libtpu: 0.0.40
codegen_flags: <defaults>
</compile_context>

<pallas_src>
import jax
import jax.numpy as jnp
from jax import lax
from jax.experimental import pallas as pl
from jax.experimental.pallas import tpu as pltpu


def _temporal_projection_kernel(x_ref, w_ref, b_ref, o_ref):
    # x_ref: (TILE_B, TILE_C, S)   w_ref: (F, S)   b_ref: (F, 1)
    # o_ref: (TILE_B, F, TILE_C)
    w = w_ref[...]                                   # (F, S), VMEM-resident
    b = b_ref[...]                                   # (F, 1), broadcasts over lanes
    # Small unrolled loop over packed batch rows (TILE_B <= 8); each row is an
    # independent (F, S) x (TILE_C, S)^T contraction -> (F, TILE_C) with lanes = C,
    # which realizes the PyTorch permute(0, 2, 1) for free.
    for ib in range(x_ref.shape[0]):
        y = lax.dot_general(
            w, x_ref[ib],
            dimension_numbers=(((1,), (1,)), ((), ())),
            preferred_element_type=jnp.float32,      # f32 MXU accumulation
        )                                            # (F, TILE_C)
        o_ref[ib] = (y + b).astype(o_ref.dtype)


def _pick_tiles(B, C, S, F, budget_bytes=8 * 1024 * 1024):
    """Choose (tile_b, tile_c).

    tile_c: full C when small (full-extent blocks are always layout-legal), otherwise
    the largest 128-multiple whose double-buffered in/out blocks stay within a
    conservative VMEM budget (safe for v5e's 16 MiB scoped default and v7x's 64 MiB
    physical VMEM).  A cdiv grid handles C not divisible by tile_c.

    tile_b: pack a few batch rows per grid step (power of two, <= 8) when the
    per-batch tile is tiny, to amortize per-grid-step overhead.
    """
    def block_bytes(tb, tc):
        # x tile + out tile, double-buffered by the pipeline, f32 worst case.
        return 2 * tb * tc * (S + F) * 4

    if C <= 256:
        tile_c = C                                   # full extent: always legal
    else:
        tile_c = 128
        for cand in (2048, 1024, 512, 256, 128):
            if cand <= C and block_bytes(1, cand) <= budget_bytes:
                tile_c = cand
                break

    tile_b = 1
    while tile_b < min(B, 8) and block_bytes(2 * tile_b, tile_c) <= budget_bytes:
        tile_b *= 2
    return tile_b, tile_c


def temporal_projection(x, weight, bias):
    """
    x:      (B, C, seq_len)
    weight: (forecast, seq_len)   (PyTorch nn.Linear layout)
    bias:   (forecast,)
    returns (B, forecast, C)  -- identical to the PyTorch module's forward.
    """
    B, C, S = x.shape
    F = weight.shape[0]
    assert weight.shape == (F, S)

    tile_b, tile_c = _pick_tiles(B, C, S, F)
    grid = (pl.cdiv(B, tile_b), pl.cdiv(C, tile_c))
    b2d = bias.reshape(F, 1)                         # broadcast over lane (channel) axis

    cost = pl.CostEstimate(
        flops=2 * B * C * S * F,
        transcendentals=0,
        bytes_accessed=x.dtype.itemsize * B * C * S
        + weight.dtype.itemsize * F * S
        + bias.dtype.itemsize * F
        + x.dtype.itemsize * B * F * C,
    )

    out = pl.pallas_call(
        _temporal_projection_kernel,
        out_shape=jax.ShapeDtypeStruct((B, F, C), x.dtype),
        grid_spec=pltpu.PrefetchScalarGridSpec(
            num_scalar_prefetch=0,
            grid=grid,
            in_specs=[
                # X: a batch pack x channel tile, full seq_len -> pipelined DMA.
                pl.BlockSpec((tile_b, tile_c, S), lambda bi, ci: (bi, ci, 0)),
                # W and bias: same block every step -> VMEM-resident (no re-DMA).
                pl.BlockSpec((F, S), lambda bi, ci: (0, 0)),
                pl.BlockSpec((F, 1), lambda bi, ci: (0, 0)),
            ],
            # Output already in (B, forecast, C) layout: permute fused, lanes = channels.
            out_specs=pl.BlockSpec((tile_b, F, tile_c), lambda bi, ci: (bi, 0, ci)),
        ),
        compiler_params=pltpu.CompilerParams(
            dimension_semantics=("parallel", "parallel"),
        ),
        cost_estimate=cost,
    )(x, weight, b2d)

    return out


def _reference(x, weight, bias):
    # Pure-JAX reference of the PyTorch forward.
    y = jnp.einsum("bcs,fs->bcf", x, weight) + bias[None, None, :]
    return jnp.transpose(y, (0, 2, 1))


if __name__ == "__main__":
    # Small shapes consistent with the module: batch=2, channels=16, seq_len=8, forecast=1.
    B, C, SEQ_LEN, FORECAST = 2, 16, 8, 1

    key = jax.random.PRNGKey(0)
    kx, kw, kb = jax.random.split(key, 3)

    x = jax.random.normal(kx, (B, C, SEQ_LEN), dtype=jnp.float32)

    # Deterministic parameter init mirroring nn.Linear's U(-1/sqrt(in), 1/sqrt(in)).
    bound = 1.0 / (SEQ_LEN ** 0.5)
    weight = jax.random.uniform(kw, (FORECAST, SEQ_LEN), minval=-bound, maxval=bound,
                                dtype=jnp.float32)
    bias = jax.random.uniform(kb, (FORECAST,), minval=-bound, maxval=bound,
                              dtype=jnp.float32)

    out = jax.block_until_ready(temporal_projection(x, weight, bias))

    ref = _reference(x, weight, bias)
    assert out.shape == (B, FORECAST, C), out.shape
    assert jnp.allclose(out, ref, atol=1e-5, rtol=1e-5), "mismatch vs reference"

    print("KERNEL_OK")
</pallas_src>

<mosaic_0001>
module attributes {stable_mosaic.version = 11 : i64} {
  func.func @_temporal_projection_kernel(%arg0: i32, %arg1: i32, %arg2: memref<2x16x8xf32, #tpu.memory_space<vmem>>, %arg3: memref<1x8xf32, #tpu.memory_space<vmem>>, %arg4: memref<1x1xf32, #tpu.memory_space<vmem>>, %arg5: memref<2x1x16xf32, #tpu.memory_space<vmem>>) attributes {dimension_semantics = [#tpu.dimension_semantics<parallel>, #tpu.dimension_semantics<parallel>], iteration_bounds = array<i64: 1, 1>, scalar_prefetch = 0 : i64, scratch_operands = 0 : i64, tpu.core_type = #tpu.core_type<tc>, window_params = [{transform_indices = @transform_0, window_bounds = array<i64: 2, 16, 8>}, {pipeline_mode = #tpu.pipeline_mode<synchronous>, transform_indices = @transform_1, window_bounds = array<i64: 1, 8>}, {pipeline_mode = #tpu.pipeline_mode<synchronous>, transform_indices = @transform_2, window_bounds = array<i64: 1, 1>}, {transform_indices = @transform_3, window_bounds = array<i64: 2, 1, 16>}]} {
    %c0 = arith.constant 0 : index
    %c0_0 = arith.constant 0 : index
    %0 = vector.load %arg3[%c0, %c0_0] : memref<1x8xf32, #tpu.memory_space<vmem>>, vector<1x8xf32>
    %c0_1 = arith.constant 0 : index
    %c0_2 = arith.constant 0 : index
    %1 = vector.load %arg4[%c0_1, %c0_2] : memref<1x1xf32, #tpu.memory_space<vmem>>, vector<1x1xf32>
    %c0_3 = arith.constant 0 : index
    %c0_4 = arith.constant 0 : index
    %c0_5 = arith.constant 0 : index
    %2 = vector.load %arg2[%c0_3, %c0_4, %c0_5] : memref<2x16x8xf32, #tpu.memory_space<vmem>>, vector<1x16x8xf32>
    %3 = vector.shape_cast %2 : vector<1x16x8xf32> to vector<16x8xf32>
    %cst = arith.constant dense<0.000000e+00> : vector<1x16xf32>
    %4 = tpu.matmul %0, %3, %cst {dimension_numbers = #tpu.dot_dimension_numbers<[1], [1], [0], [0], [0, 0, 1, 0], [], []>} : vector<1x8xf32>, vector<16x8xf32>, vector<1x16xf32> -> vector<1x16xf32>
    %5 = vector.broadcast %1 : vector<1x1xf32> to vector<1x16xf32>
    %6 = arith.addf %4, %5 : vector<1x16xf32>
    %c0_6 = arith.constant 0 : index
    %c0_7 = arith.constant 0 : index
    %c0_8 = arith.constant 0 : index
    %7 = vector.load %arg5[%c0_6, %c0_7, %c0_8] : memref<2x1x16xf32, #tpu.memory_space<vmem>>, vector<1x1x16xf32>
    %8 = vector.shape_cast %7 : vector<1x1x16xf32> to vector<1x16xf32>
    %9 = vector.shape_cast %6 : vector<1x16xf32> to vector<1x1x16xf32>
    tpu.vector_store %arg5[%c0_6, %c0_7, %c0_8], %9 {strides = array<i32>} : memref<2x1x16xf32, #tpu.memory_space<vmem>>, vector<1x1x16xf32>,
    %c1 = arith.constant 1 : index
    %c0_9 = arith.constant 0 : index
    %c0_10 = arith.constant 0 : index
    %10 = vector.load %arg2[%c1, %c0_9, %c0_10] : memref<2x16x8xf32, #tpu.memory_space<vmem>>, vector<1x16x8xf32>
    %11 = vector.shape_cast %10 : vector<1x16x8xf32> to vector<16x8xf32>
    %cst_11 = arith.constant dense<0.000000e+00> : vector<1x16xf32>
    %12 = tpu.matmul %0, %11, %cst_11 {dimension_numbers = #tpu.dot_dimension_numbers<[1], [1], [0], [0], [0, 0, 1, 0], [], []>} : vector<1x8xf32>, vector<16x8xf32>, vector<1x16xf32> -> vector<1x16xf32>
    %13 = vector.broadcast %1 : vector<1x1xf32> to vector<1x16xf32>
    %14 = arith.addf %12, %13 : vector<1x16xf32>
    %c1_12 = arith.constant 1 : index
    %c0_13 = arith.constant 0 : index
    %c0_14 = arith.constant 0 : index
    %15 = vector.load %arg5[%c1_12, %c0_13, %c0_14] : memref<2x1x16xf32, #tpu.memory_space<vmem>>, vector<1x1x16xf32>
    %16 = vector.shape_cast %15 : vector<1x1x16xf32> to vector<1x16xf32>
    %17 = vector.shape_cast %14 : vector<1x16xf32> to vector<1x1x16xf32>
    tpu.vector_store %arg5[%c1_12, %c0_13, %c0_14], %17 {strides = array<i32>} : memref<2x1x16xf32, #tpu.memory_space<vmem>>, vector<1x1x16xf32>,
    return
  }
  func.func @transform_0(%arg0: i32, %arg1: i32) -> (i32, i32, i32) {
    %c0_i32 = arith.constant 0 : i32
    %c0_i32_0 = arith.constant 0 : i32
    return %arg0, %arg1, %c0_i32 : i32, i32, i32
  }
  func.func @transform_1(%arg0: i32, %arg1: i32) -> (i32, i32) {
    %c0_i32 = arith.constant 0 : i32
    %c0_i32_0 = arith.constant 0 : i32
    %c0_i32_1 = arith.constant 0 : i32
    return %c0_i32, %c0_i32_0 : i32, i32
  }
  func.func @transform_2(%arg0: i32, %arg1: i32) -> (i32, i32) {
    %c0_i32 = arith.constant 0 : i32
    %c0_i32_0 = arith.constant 0 : i32
    %c0_i32_1 = arith.constant 0 : i32
    return %c0_i32, %c0_i32_0 : i32, i32
  }
  func.func @transform_3(%arg0: i32, %arg1: i32) -> (i32, i32, i32) {
    %c0_i32 = arith.constant 0 : i32
    %c0_i32_0 = arith.constant 0 : i32
    return %arg0, %c0_i32, %arg1 : i32, i32, i32
  }
}

</mosaic_0001>

<bundles_post_ra>
// kernel: tpu_custom_call.1
= control target key start
LH: loop header
LB: loop body
LE: loop exit
PB: predicated region body
PF: predicated region fallthrough
CT: control target
= control target key end

     0   :  { %s338_s0 = inlined_call_operand.vmem [shape: f32[2,16,8], index: 0, kind: input, shape index: {}]   ;;  %s339_s1 = inlined_call_operand.vmem [shape: f32[1,8], index: 1, kind: input, shape index: {}]   ;;  %s340_s2 = inlined_call_operand.<no memory space> [shape: f32[1,1], index: 2, kind: input, shape index: {}]   ;;  %s341_s3 = inlined_call_operand.hbm [shape: f32[2,1,16], index: 3, kind: output, shape index: {}]  }
   0x1   :  { %v8_v0 = vstv %s340_s2 }
   0x2   :  { %9 = vst [vmem:[#allocation2] sm:$0x1] %v8_v0 }
   0x3   :  { %v19_v1 = vld [vmem:[%s338_s0] sm:$0xff]  ;;  %v20_v2 = vld [vmem:[%s338_s0 + $0x8] sm:$0xff]  ;;  %vm30_vm0 = vcmask 64512   ;;  %v212_v3 = vld [vmem:[%s338_s0 + $0x10] sm:$0xff]  ;;  %v277_v4 = vmov 0.0|0.0   ;;  %vm278_vm2 = vmmov 0  }
   0x4   :  { %237 = vmatprep.subr.bf16.mxu0 %v277_v4  ;;  %241 = vmatprep.subr.bf16.mxu1 %v277_v4  ;;  %v238_v5 = vpack.c.bf16 %v20_v2, %v19_v1  ;;  %vm239_vm1 = vmpackc.low %vm30_vm0, %vm30_vm0  ;;  %v213_v6 = vld [vmem:[%s338_s0 + $0x18] sm:$0xff]  ;;  %v279_v8 = vmov 0.0  }
   0x5   :  { %v242_v7 = vpack.c.bf16 %v213_v6, %v212_v3  ;;  %227 = vmatprep.mubr.msk.f32.mxu0 %vm278_vm2, %v279_v8  ;;  %234 = vmatprep.mubr.msk.f32.mxu1 %vm278_vm2, %v279_v8 }
   0x9   :  { %v18_v9 = vld [vmem:[#allocation2] sm:$0x1] }
   0xa   :  { %10 = vsyncpa [#allocation4], 0  ;;  %240 = vmatpush3.bf16.xpose.msk.msra.mxu0 %vm239_vm1, %v238_v5  ;;  %v280_v10 = vmov 0   ;;  %244 = vmatpush3.bf16.xpose.msk.msra.mxu1 %vm239_vm1, %v242_v7  ;;  %v17_v11 = vld [vmem:[%s339_s1] sm:$0x1]  ;;  %v26_v12 = vlaneseq  ;;  %s281_s0 = smov [#allocation3]  }
   0xb   :  { %252 = vset.pattern.permute.xlu0 %v280_v10  ;;  %s198_s23 = sshll.u32 %s281_s0, 4  ;;  %vm110_vm3 = vcmask 122880   ;;  %s199_s23 = int_to_ptr.vmem [resolvable:$true] %s198_s23 }
   0xc   :  { %23 = vperm.xlu0 %252, %v18_v9   ;;  %v27_v13 = vshrl.u32 %v26_v12, 7  ;;  %s253_s1 = scalar_lea.vmem %s199_s23, 32  ;;  %p258_p1 = scmp.lt.s32.totalorder %s199_s23, %s199_s23 }
   0xd   :  { %p254_p0 = scmp.ne.s32.totalorder %s199_s23, %s253_s1  ;;  %p259_p2 = scmp.lt.s32.totalorder %s253_s1, %s253_s1 }
   0xe   :  { %v28_v14 = vsub.s32 0, %v27_v13 }
   0xf   :  { %p260_p3 = por %p259_p2, %p258_p1 }
  0x11   :  { %228 = vmatmul.mubr.msk.f32.vlgmr.msra.gmra.mrb[0].mxu0 %vm30_vm0, %v17_v11  ;;  %235 = vmatmul.mubr.msk.f32.vlgmr.msra.gmra.mrb[0].mxu1 %vm30_vm0, %v17_v11  ;;  %p261_p4 = pnand %p260_p3, %p254_p0 }
  0x8b   :  { %v24_v15 = vpop.permute.xlu0 %23 }
  0x8c   :  { %v29_v16 = vrot.slane %v24_v15, %v28_v14 }
  0xe4   :  { %v106_v17 = vpop.f32.mrb[0].mxu0  ;;  %v187_v19 = vpop.f32.mrb[0].mxu1 }
  0xe5   :  { %v107_v18 = vadd.f32 %v106_v17, %v29_v16  ;;  %v229_v20 = vpop.f32.mrb[1].mxu0  ;;  %v188_v21 = vadd.f32 %v187_v19, %v29_v16  ;;  %v236_v22 = vpop.f32.mrb[1].mxu1 }
  0xe7   :  { %111 = vst.msk [vmem:[#allocation3] sm:$0x1] %vm110_vm3, %v107_v18  ;;  %192 = vst.msk [vmem:[#allocation3 + $0x1] sm:$0x1] %vm110_vm3, %v188_v21 }
  0xe8   :  { %264 = shalt.err (!%p261_p4)
}
  0xe9   :  { %s265_s26 = scalar_lea.hbm %s341_s3, 32 }
  0xea   :  { %p266_p5 = scmp.ne.s32.totalorder %s341_s3, %s265_s26  ;;  %p269_p6 = scmp.lt.u32.totalorder %s265_s26, %s341_s3 }
  0xec   :  { %p271_p7 = pnand %p269_p6, %p266_p5 }
  0xee   :  { %274 = shalt.err (!%p271_p7)
}
  0xef   :  { %s282_s4 = smov 16   ;;  %s283_s5 = smov 1  }
  0xf0   :  { %204 = dma.vmem_to_hbm [thread:$0]  %s199_s23, 32, %s341_s3, [#allocation4], %s282_s4, %s282_s4, %s283_s5  }
  0xf1   :  { %275 = dma.done.wait [#allocation4], 32  }
  0xf2   :  { %276 = vsyncadd [#allocation4], 4294967264 }
  0xf3   :  { %208 = vsyncpa [#allocation4], 1 }

</bundles_post_ra>
